<compile_context>
chip_gen: v6e
topology: v6e:2x2x1
jax: 0.10.0
libtpu: 0.0.40
codegen_flags: <defaults>
</compile_context>

<pallas_src>
import functools
import math
from typing import NamedTuple, Tuple

import jax
import jax.numpy as jnp
from jax.experimental import pallas as pl
from jax.experimental.pallas import tpu as pltpu

_LANE = 128
_NEG_MASK = -1e30

# Cached probe: does this JAX build accept pipeline_mode=pl.Buffered(1) on pallas_call
# BlockSpecs?  None = unknown, True/False once probed.
_SINGLE_BUFFER_WEIGHTS_OK = None


def _round_up(x, m):
    return ((x + m - 1) // m) * m


def _vmem_capacity_bytes():
    """Physical VMEM per TensorCore; conservative fallback if the query fails."""
    try:
        info = pltpu.get_tpu_info()
        cap = getattr(info, "vmem_capacity_bytes", None)
        if cap:
            return int(cap)
    except Exception:
        pass
    return 64 * 1024 * 1024  # v7x per-TC size (the smallest of the supported parts)


def _pick_batch_tile(batch, requested):
    """bf16 x packs 16 sublanes/vreg -> tiles are multiples of 16; large batches get
    MXU-aligned (128) tiles; keep >= 2 grid steps when possible so
    dimension_semantics=("parallel",) can split the batch across v7x's two cores."""
    requested = max(16, int(requested))
    if batch >= 2 * _LANE:
        tb = _round_up(requested, _LANE)
        tb = min(tb, _round_up(pl.cdiv(batch, 2), _LANE))  # keep >= 2 grid steps
        return max(tb, _LANE)
    if batch > 16:
        tb = min(_round_up(requested, 16), _round_up(pl.cdiv(batch, 2), 16))
        return max(tb, 16)
    return 16


class PreparedParams(NamedTuple):
    flat: Tuple[jax.Array, ...]  # (w0, b0, w1, b1, ...): w bf16 padded, b f32 padded
    in_dim: int
    out_dim: int
    in_pad: int
    out_pad: int
    max_width: int
    n_linear: int


def prepare_params(params):
    """Pad feature dims to 128 lanes and cast weights to bf16 ONCE (call this outside
    the per-step forward).  The last layer's padded bias columns are set to -1e30 so
    padded logit lanes fall out of the log-softmax without any in-kernel masking."""
    n_linear = len(params)
    in_dim = params[0][0].shape[0]
    out_dim = params[-1][0].shape[1]
    in_pad = _round_up(in_dim, _LANE)

    flat = []
    prev_pad = in_pad
    max_width = in_pad
    for li, (w, b) in enumerate(params):
        fi, fo = w.shape
        fo_pad = _round_up(fo, _LANE)
        w_p = jnp.pad(w.astype(jnp.bfloat16), ((0, prev_pad - fi), (0, fo_pad - fo)))
        is_last = li == n_linear - 1
        b_p = jnp.pad(
            b.astype(jnp.float32).reshape(1, fo),
            ((0, 0), (0, fo_pad - fo)),
            constant_values=_NEG_MASK if is_last else 0.0,
        )
        flat.extend([w_p, b_p])
        prev_pad = fo_pad
        max_width = max(max_width, fo_pad)

    return PreparedParams(tuple(flat), in_dim, out_dim, in_pad, prev_pad,
                          max_width, n_linear)


def _mlp_kernel(n_linear, *refs):
    """refs = (x_ref, w0, b0, ..., w_{L-1}, b_{L-1}, out_ref).
    x/w are bf16; biases f32 (1, out_pad) rows; output dtype per out_ref."""
    x_ref = refs[0]
    out_ref = refs[-1]
    p = refs[1:-1]

    h = x_ref[...]  # bf16 (TB, in_pad)

    # Hidden layers: bf16 MXU matmul with f32 accumulation, bias + ReLU in f32 (VPU).
    for i in range(n_linear - 1):
        w = p[2 * i][...]
        b = p[2 * i + 1][...]
        acc = jnp.dot(h, w, preferred_element_type=jnp.float32) + b
        h = jnp.maximum(acc, 0.0).astype(jnp.bfloat16)

    # Final layer (no activation).  Padded columns already carry a -1e30 bias, so the
    # softmax reductions ignore them without any explicit masking here.
    w = p[-2][...]
    b = p[-1][...]
    logits = jnp.dot(h, w, preferred_element_type=jnp.float32) + b  # f32 (TB, out_pad)

    # log_softmax over dim=1 (feature axis), f32 throughout.
    m = jnp.max(logits, axis=-1, keepdims=True)
    shifted = logits - m
    lse = jnp.log(jnp.sum(jnp.exp(shifted), axis=-1, keepdims=True))
    out_ref[...] = (shifted - lse).astype(out_ref.dtype)


def custom_nn_forward(x, params, *, batch_tile=256, out_dtype=jnp.float32,
                      single_buffer_weights=True):
    """x: (B, input_shape) f32.  params: PreparedParams (preferred) or the raw list of
    (W_(in,out), b_(1,out)) f32 pairs (prepared on the fly as a convenience)."""
    global _SINGLE_BUFFER_WEIGHTS_OK

    prepared = params if isinstance(params, PreparedParams) else prepare_params(params)
    batch, in_dim = x.shape
    assert in_dim == prepared.in_dim, "input feature dim mismatch"

    flat = prepared.flat
    in_pad, out_pad = prepared.in_pad, prepared.out_pad

    # --- Batch tiling (pad x only if actually needed). ---------------------------
    tb = _pick_batch_tile(batch, batch_tile)
    batch_pad = _round_up(batch, tb)
    x_b = x.astype(jnp.bfloat16)
    if batch_pad != batch or in_pad != in_dim:
        x_b = jnp.pad(x_b, ((0, batch_pad - batch), (0, in_pad - in_dim)))
    grid = (batch_pad // tb,)

    # --- Generation-aware VMEM budget (~3/4 of physical per-core VMEM as the cap). -
    param_bytes = sum(int(a.size) * a.dtype.itemsize for a in flat)
    out_itemsize = jnp.dtype(out_dtype).itemsize
    io_bytes = 2 * (tb * in_pad * 2 + tb * out_pad * out_itemsize)   # double-buffered tiles
    act_bytes = 4 * tb * prepared.max_width * 4                      # activation slack
    vmem_cap = (3 * _vmem_capacity_bytes()) // 4
    vmem_limit = int(min(vmem_cap,
                         max(16 * 1024 * 1024,
                             2 * param_bytes + io_bytes + act_bytes)))

    # --- Cost estimate so XLA schedules producers/consumers around the kernel. ----
    flops = 2 * batch_pad * sum(
        int(flat[2 * i].shape[0]) * int(flat[2 * i].shape[1])
        for i in range(prepared.n_linear))
    cost = pl.CostEstimate(
        flops=int(flops),
        transcendentals=int(batch_pad * (out_pad + 1)),
        bytes_accessed=int(batch_pad * in_pad * 2 + param_bytes
                           + batch_pad * out_pad * out_itemsize),
    )

    compiler_params = pltpu.CompilerParams(
        dimension_semantics=("parallel",),
        vmem_limit_bytes=vmem_limit,
    )
    kernel = functools.partial(_mlp_kernel, prepared.n_linear)
    out_spec = pl.BlockSpec((tb, out_pad), lambda i: (i, 0))

    # Weights/biases use a constant index map (VMEM-resident); request single
    # buffering so they are not needlessly double-buffered.  Fall back (once) to the
    # default specs if this JAX build rejects pipeline_mode on pallas_call specs.
    if single_buffer_weights and _SINGLE_BUFFER_WEIGHTS_OK is not False:
        attempts = (True, False) if _SINGLE_BUFFER_WEIGHTS_OK is None else (True,)
    else:
        attempts = (False,)

    out_padded = None
    last_err = None
    for use_single in attempts:
        try:
            in_specs = [pl.BlockSpec((tb, in_pad), lambda i: (i, 0))]
            for arr in flat:
                if use_single:
                    in_specs.append(pl.BlockSpec(arr.shape, lambda i: (0, 0),
                                                 pipeline_mode=pl.Buffered(1)))
                else:
                    in_specs.append(pl.BlockSpec(arr.shape, lambda i: (0, 0)))
            out_padded = pl.pallas_call(
                kernel,
                out_shape=jax.ShapeDtypeStruct((batch_pad, out_pad), out_dtype),
                grid=grid,
                in_specs=in_specs,
                out_specs=out_spec,
                compiler_params=compiler_params,
                cost_estimate=cost,
            )(x_b, *flat)
            if len(attempts) > 1:           # probing: force compile/run now
                out_padded = jax.block_until_ready(out_padded)
            if use_single:
                _SINGLE_BUFFER_WEIGHTS_OK = True
            break
        except Exception as e:              # pragma: no cover - probe fallback
            last_err = e
            out_padded = None
            if use_single:
                _SINGLE_BUFFER_WEIGHTS_OK = False
    if out_padded is None:
        raise last_err

    return out_padded[:batch, :prepared.out_dim]


def init_params(key, input_shape, output_shape, hidden_size, n_layers):
    """Replicates CustomNN.__init__'s layer-size logic with PyTorch-style
    uniform(-1/sqrt(fan_in), 1/sqrt(fan_in)) init, deterministically."""
    dims = [(input_shape, hidden_size[0][0])]
    for i in range(0, n_layers - 2 - 1):
        dims.append((hidden_size[i][0], hidden_size[i][1]))
    dims.append((hidden_size[-1][1], output_shape))

    params = []
    for (fan_in, fan_out) in dims:
        key, kw, kb = jax.random.split(key, 3)
        bound = 1.0 / math.sqrt(fan_in)
        # store weight already transposed: (in, out)
        w = jax.random.uniform(kw, (fan_in, fan_out), jnp.float32, -bound, bound)
        b = jax.random.uniform(kb, (1, fan_out), jnp.float32, -bound, bound)
        params.append((w, b))
    return params


def reference_forward(x, params):
    """Pure-JAX reference emulating the kernel's bf16-operand / f32-accumulate math."""
    h = x.astype(jnp.bfloat16)
    for w, b in params[:-1]:
        a = jnp.dot(h, w.astype(jnp.bfloat16),
                    preferred_element_type=jnp.float32) + b
        h = jnp.maximum(a, 0.0).astype(jnp.bfloat16)
    w, b = params[-1]
    logits = jnp.dot(h, w.astype(jnp.bfloat16),
                     preferred_element_type=jnp.float32) + b
    return jax.nn.log_softmax(logits, axis=1)


if __name__ == "__main__":
    # Small, module-consistent shapes; batch_tile=32 exercises a 2-step batch grid.
    batch = 64
    input_shape = 16
    output_shape = 8
    hidden_size = [(32, 32)]   # list of (in, out) tuples per hidden layer
    n_layers = 4               # => layers: 16->32, 32->32, 32->8

    key = jax.random.PRNGKey(0)
    key, kx = jax.random.split(key)
    x = jax.random.normal(kx, (batch, input_shape), jnp.float32)

    params = init_params(key, input_shape, output_shape, hidden_size, n_layers)
    prepared = prepare_params(params)      # one-time pad + bf16 cast (cache this)

    out = custom_nn_forward(x, prepared, batch_tile=32)
    out = jax.block_until_ready(out)

    ref = reference_forward(x, params)
    assert out.shape == (batch, output_shape)
    assert jnp.allclose(out, ref, atol=5e-3, rtol=5e-3), "mismatch vs JAX reference"

    print("KERNEL_OK")
</pallas_src>

<mosaic_0001>
module attributes {stable_mosaic.version = 11 : i64} {
  func.func @_mlp_kernel(%arg0: i32, %arg1: memref<32x128xbf16, #tpu.memory_space<vmem>>, %arg2: memref<128x128xbf16, #tpu.memory_space<vmem>>, %arg3: memref<1x128xf32, #tpu.memory_space<vmem>>, %arg4: memref<128x128xbf16, #tpu.memory_space<vmem>>, %arg5: memref<1x128xf32, #tpu.memory_space<vmem>>, %arg6: memref<128x128xbf16, #tpu.memory_space<vmem>>, %arg7: memref<1x128xf32, #tpu.memory_space<vmem>>, %arg8: memref<32x128xf32, #tpu.memory_space<vmem>>) attributes {dimension_semantics = [#tpu.dimension_semantics<parallel>], iteration_bounds = array<i64: 2>, scalar_prefetch = 0 : i64, scratch_operands = 0 : i64, tpu.core_type = #tpu.core_type<tc>, window_params = [{transform_indices = @transform_0, window_bounds = array<i64: 32, 128>}, {pipeline_mode = #tpu.pipeline_mode<synchronous>, transform_indices = @transform_1, window_bounds = array<i64: 128, 128>}, {pipeline_mode = #tpu.pipeline_mode<synchronous>, transform_indices = @transform_2, window_bounds = array<i64: 1, 128>}, {pipeline_mode = #tpu.pipeline_mode<synchronous>, transform_indices = @transform_3, window_bounds = array<i64: 128, 128>}, {pipeline_mode = #tpu.pipeline_mode<synchronous>, transform_indices = @transform_4, window_bounds = array<i64: 1, 128>}, {pipeline_mode = #tpu.pipeline_mode<synchronous>, transform_indices = @transform_5, window_bounds = array<i64: 128, 128>}, {pipeline_mode = #tpu.pipeline_mode<synchronous>, transform_indices = @transform_6, window_bounds = array<i64: 1, 128>}, {transform_indices = @transform_7, window_bounds = array<i64: 32, 128>}]} {
    %c0 = arith.constant 0 : index
    %c0_0 = arith.constant 0 : index
    %0 = vector.load %arg1[%c0, %c0_0] : memref<32x128xbf16, #tpu.memory_space<vmem>>, vector<32x128xbf16>
    %c0_1 = arith.constant 0 : index
    %c0_2 = arith.constant 0 : index
    %1 = vector.load %arg2[%c0_1, %c0_2] : memref<128x128xbf16, #tpu.memory_space<vmem>>, vector<128x128xbf16>
    %c0_3 = arith.constant 0 : index
    %c0_4 = arith.constant 0 : index
    %2 = vector.load %arg3[%c0_3, %c0_4] : memref<1x128xf32, #tpu.memory_space<vmem>>, vector<1x128xf32>
    %cst = arith.constant dense<0.000000e+00> : vector<32x128xf32>
    %3 = tpu.matmul %0, %1, %cst {dimension_numbers = #tpu.dot_dimension_numbers<[1], [0], [0], [1], [0, 0, 1, 1], [], []>} : vector<32x128xbf16>, vector<128x128xbf16>, vector<32x128xf32> -> vector<32x128xf32>
    %4 = vector.broadcast %2 : vector<1x128xf32> to vector<32x128xf32>
    %5 = arith.addf %3, %4 : vector<32x128xf32>
    %cst_5 = arith.constant 0.000000e+00 : f32
    %6 = vector.broadcast %cst_5 : f32 to vector<32x128xf32>
    %7 = arith.maximumf %5, %6 : vector<32x128xf32>
    %8 = arith.truncf %7 : vector<32x128xf32> to vector<32x128xbf16>
    %c0_6 = arith.constant 0 : index
    %c0_7 = arith.constant 0 : index
    %9 = vector.load %arg4[%c0_6, %c0_7] : memref<128x128xbf16, #tpu.memory_space<vmem>>, vector<128x128xbf16>
    %c0_8 = arith.constant 0 : index
    %c0_9 = arith.constant 0 : index
    %10 = vector.load %arg5[%c0_8, %c0_9] : memref<1x128xf32, #tpu.memory_space<vmem>>, vector<1x128xf32>
    %cst_10 = arith.constant dense<0.000000e+00> : vector<32x128xf32>
    %11 = tpu.matmul %8, %9, %cst_10 {dimension_numbers = #tpu.dot_dimension_numbers<[1], [0], [0], [1], [0, 0, 1, 1], [], []>} : vector<32x128xbf16>, vector<128x128xbf16>, vector<32x128xf32> -> vector<32x128xf32>
    %12 = vector.broadcast %10 : vector<1x128xf32> to vector<32x128xf32>
    %13 = arith.addf %11, %12 : vector<32x128xf32>
    %cst_11 = arith.constant 0.000000e+00 : f32
    %14 = vector.broadcast %cst_11 : f32 to vector<32x128xf32>
    %15 = arith.maximumf %13, %14 : vector<32x128xf32>
    %16 = arith.truncf %15 : vector<32x128xf32> to vector<32x128xbf16>
    %c0_12 = arith.constant 0 : index
    %c0_13 = arith.constant 0 : index
    %17 = vector.load %arg6[%c0_12, %c0_13] : memref<128x128xbf16, #tpu.memory_space<vmem>>, vector<128x128xbf16>
    %c0_14 = arith.constant 0 : index
    %c0_15 = arith.constant 0 : index
    %18 = vector.load %arg7[%c0_14, %c0_15] : memref<1x128xf32, #tpu.memory_space<vmem>>, vector<1x128xf32>
    %cst_16 = arith.constant dense<0.000000e+00> : vector<32x128xf32>
    %19 = tpu.matmul %16, %17, %cst_16 {dimension_numbers = #tpu.dot_dimension_numbers<[1], [0], [0], [1], [0, 0, 1, 1], [], []>} : vector<32x128xbf16>, vector<128x128xbf16>, vector<32x128xf32> -> vector<32x128xf32>
    %20 = vector.broadcast %18 : vector<1x128xf32> to vector<32x128xf32>
    %21 = arith.addf %19, %20 : vector<32x128xf32>
    %cst_17 = arith.constant dense<0xFF800000> : vector<32xf32>
    %22 = vector.multi_reduction <maximumf>, %21, %cst_17 [1] : vector<32x128xf32> to vector<32xf32>
    %23 = vector.shape_cast %22 : vector<32xf32> to vector<32x1xf32>
    %24 = vector.broadcast %23 : vector<32x1xf32> to vector<32x128xf32>
    %25 = arith.subf %21, %24 : vector<32x128xf32>
    %26 = math.exp %25 : vector<32x128xf32>
    %cst_18 = arith.constant dense<0.000000e+00> : vector<32xf32>
    %27 = vector.multi_reduction <add>, %26, %cst_18 [1] : vector<32x128xf32> to vector<32xf32>
    %28 = vector.shape_cast %27 : vector<32xf32> to vector<32x1xf32>
    %29 = math.log %28 : vector<32x1xf32>
    %30 = vector.broadcast %29 : vector<32x1xf32> to vector<32x128xf32>
    %31 = arith.subf %25, %30 : vector<32x128xf32>
    %c0_19 = arith.constant 0 : index
    %c0_20 = arith.constant 0 : index
    %32 = vector.load %arg8[%c0_19, %c0_20] : memref<32x128xf32, #tpu.memory_space<vmem>>, vector<32x128xf32>
    tpu.vector_store %arg8[%c0_19, %c0_20], %31 {strides = array<i32>} : memref<32x128xf32, #tpu.memory_space<vmem>>, vector<32x128xf32>,
    return
  }
  func.func @transform_0(%arg0: i32) -> (i32, i32) {
    %c0_i32 = arith.constant 0 : i32
    %c0_i32_0 = arith.constant 0 : i32
    return %arg0, %c0_i32 : i32, i32
  }
  func.func @transform_1(%arg0: i32) -> (i32, i32) {
    %c0_i32 = arith.constant 0 : i32
    %c0_i32_0 = arith.constant 0 : i32
    %c0_i32_1 = arith.constant 0 : i32
    return %c0_i32, %c0_i32_0 : i32, i32
  }
  func.func @transform_2(%arg0: i32) -> (i32, i32) {
    %c0_i32 = arith.constant 0 : i32
    %c0_i32_0 = arith.constant 0 : i32
    %c0_i32_1 = arith.constant 0 : i32
    return %c0_i32, %c0_i32_0 : i32, i32
  }
  func.func @transform_3(%arg0: i32) -> (i32, i32) {
    %c0_i32 = arith.constant 0 : i32
    %c0_i32_0 = arith.constant 0 : i32
    %c0_i32_1 = arith.constant 0 : i32
    return %c0_i32, %c0_i32_0 : i32, i32
  }
  func.func @transform_4(%arg0: i32) -> (i32, i32) {
    %c0_i32 = arith.constant 0 : i32
    %c0_i32_0 = arith.constant 0 : i32
    %c0_i32_1 = arith.constant 0 : i32
    return %c0_i32, %c0_i32_0 : i32, i32
  }
  func.func @transform_5(%arg0: i32) -> (i32, i32) {
    %c0_i32 = arith.constant 0 : i32
    %c0_i32_0 = arith.constant 0 : i32
    %c0_i32_1 = arith.constant 0 : i32
    return %c0_i32, %c0_i32_0 : i32, i32
  }
  func.func @transform_6(%arg0: i32) -> (i32, i32) {
    %c0_i32 = arith.constant 0 : i32
    %c0_i32_0 = arith.constant 0 : i32
    %c0_i32_1 = arith.constant 0 : i32
    return %c0_i32, %c0_i32_0 : i32, i32
  }
  func.func @transform_7(%arg0: i32) -> (i32, i32) {
    %c0_i32 = arith.constant 0 : i32
    %c0_i32_0 = arith.constant 0 : i32
    return %arg0, %c0_i32 : i32, i32
  }
}

module attributes {stable_mosaic.version = 11 : i64} {
  func.func @_mlp_kernel(%arg0: i32, %arg1: memref<32x128xbf16, #tpu.memory_space<vmem>>, %arg2: memref<128x128xbf16, #tpu.memory_space<vmem>>, %arg3: memref<1x128xf32, #tpu.memory_space<vmem>>, %arg4: memref<128x128xbf16, #tpu.memory_space<vmem>>, %arg5: memref<1x128xf32, #tpu.memory_space<vmem>>, %arg6: memref<128x128xbf16, #tpu.memory_space<vmem>>, %arg7: memref<1x128xf32, #tpu.memory_space<vmem>>, %arg8: memref<32x128xf32, #tpu.memory_space<vmem>>) attributes {dimension_semantics = [#tpu.dimension_semantics<parallel>], iteration_bounds = array<i64: 2>, scalar_prefetch = 0 : i64, scratch_operands = 0 : i64, tpu.core_type = #tpu.core_type<tc>, window_params = [{transform_indices = @transform_0, window_bounds = array<i64: 32, 128>}, {pipeline_mode = #tpu.pipeline_mode<synchronous>, transform_indices = @transform_1, window_bounds = array<i64: 128, 128>}, {pipeline_mode = #tpu.pipeline_mode<synchronous>, transform_indices = @transform_2, window_bounds = array<i64: 1, 128>}, {pipeline_mode = #tpu.pipeline_mode<synchronous>, transform_indices = @transform_3, window_bounds = array<i64: 128, 128>}, {pipeline_mode = #tpu.pipeline_mode<synchronous>, transform_indices = @transform_4, window_bounds = array<i64: 1, 128>}, {pipeline_mode = #tpu.pipeline_mode<synchronous>, transform_indices = @transform_5, window_bounds = array<i64: 128, 128>}, {pipeline_mode = #tpu.pipeline_mode<synchronous>, transform_indices = @transform_6, window_bounds = array<i64: 1, 128>}, {transform_indices = @transform_7, window_bounds = array<i64: 32, 128>}]} {
    %c0 = arith.constant 0 : index
    %c0_0 = arith.constant 0 : index
    %0 = vector.load %arg1[%c0, %c0_0] : memref<32x128xbf16, #tpu.memory_space<vmem>>, vector<32x128xbf16>
    %c0_1 = arith.constant 0 : index
    %c0_2 = arith.constant 0 : index
    %1 = vector.load %arg2[%c0_1, %c0_2] : memref<128x128xbf16, #tpu.memory_space<vmem>>, vector<128x128xbf16>
    %c0_3 = arith.constant 0 : index
    %c0_4 = arith.constant 0 : index
    %2 = vector.load %arg3[%c0_3, %c0_4] : memref<1x128xf32, #tpu.memory_space<vmem>>, vector<1x128xf32>
    %cst = arith.constant dense<0.000000e+00> : vector<32x128xf32>
    %3 = tpu.matmul %0, %1, %cst {dimension_numbers = #tpu.dot_dimension_numbers<[1], [0], [0], [1], [0, 0, 1, 1], [], []>} : vector<32x128xbf16>, vector<128x128xbf16>, vector<32x128xf32> -> vector<32x128xf32>
    %4 = vector.broadcast %2 : vector<1x128xf32> to vector<32x128xf32>
    %5 = arith.addf %3, %4 : vector<32x128xf32>
    %cst_5 = arith.constant 0.000000e+00 : f32
    %6 = vector.broadcast %cst_5 : f32 to vector<32x128xf32>
    %7 = arith.maximumf %5, %6 : vector<32x128xf32>
    %8 = arith.truncf %7 : vector<32x128xf32> to vector<32x128xbf16>
    %c0_6 = arith.constant 0 : index
    %c0_7 = arith.constant 0 : index
    %9 = vector.load %arg4[%c0_6, %c0_7] : memref<128x128xbf16, #tpu.memory_space<vmem>>, vector<128x128xbf16>
    %c0_8 = arith.constant 0 : index
    %c0_9 = arith.constant 0 : index
    %10 = vector.load %arg5[%c0_8, %c0_9] : memref<1x128xf32, #tpu.memory_space<vmem>>, vector<1x128xf32>
    %cst_10 = arith.constant dense<0.000000e+00> : vector<32x128xf32>
    %11 = tpu.matmul %8, %9, %cst_10 {dimension_numbers = #tpu.dot_dimension_numbers<[1], [0], [0], [1], [0, 0, 1, 1], [], []>} : vector<32x128xbf16>, vector<128x128xbf16>, vector<32x128xf32> -> vector<32x128xf32>
    %12 = vector.broadcast %10 : vector<1x128xf32> to vector<32x128xf32>
    %13 = arith.addf %11, %12 : vector<32x128xf32>
    %cst_11 = arith.constant 0.000000e+00 : f32
    %14 = vector.broadcast %cst_11 : f32 to vector<32x128xf32>
    %15 = arith.maximumf %13, %14 : vector<32x128xf32>
    %16 = arith.truncf %15 : vector<32x128xf32> to vector<32x128xbf16>
    %c0_12 = arith.constant 0 : index
    %c0_13 = arith.constant 0 : index
    %17 = vector.load %arg6[%c0_12, %c0_13] : memref<128x128xbf16, #tpu.memory_space<vmem>>, vector<128x128xbf16>
    %c0_14 = arith.constant 0 : index
    %c0_15 = arith.constant 0 : index
    %18 = vector.load %arg7[%c0_14, %c0_15] : memref<1x128xf32, #tpu.memory_space<vmem>>, vector<1x128xf32>
    %cst_16 = arith.constant dense<0.000000e+00> : vector<32x128xf32>
    %19 = tpu.matmul %16, %17, %cst_16 {dimension_numbers = #tpu.dot_dimension_numbers<[1], [0], [0], [1], [0, 0, 1, 1], [], []>} : vector<32x128xbf16>, vector<128x128xbf16>, vector<32x128xf32> -> vector<32x128xf32>
    %20 = vector.broadcast %18 : vector<1x128xf32> to vector<32x128xf32>
    %21 = arith.addf %19, %20 : vector<32x128xf32>
    %cst_17 = arith.constant dense<0xFF800000> : vector<32xf32>
    %22 = vector.multi_reduction <maximumf>, %21, %cst_17 [1] : vector<32x128xf32> to vector<32xf32>
    %23 = vector.shape_cast %22 : vector<32xf32> to vector<32x1xf32>
    %24 = vector.broadcast %23 : vector<32x1xf32> to vector<32x128xf32>
    %25 = arith.subf %21, %24 : vector<32x128xf32>
    %26 = math.exp %25 : vector<32x128xf32>
    %cst_18 = arith.constant dense<0.000000e+00> : vector<32xf32>
    %27 = vector.multi_reduction <add>, %26, %cst_18 [1] : vector<32x128xf32> to vector<32xf32>
    %28 = vector.shape_cast %27 : vector<32xf32> to vector<32x1xf32>
    %29 = math.log %28 : vector<32x1xf32>
    %30 = vector.broadcast %29 : vector<32x1xf32> to vector<32x128xf32>
    %31 = arith.subf %25, %30 : vector<32x128xf32>
    %c0_19 = arith.constant 0 : index
    %c0_20 = arith.constant 0 : index
    %32 = vector.load %arg8[%c0_19, %c0_20] : memref<32x128xf32, #tpu.memory_space<vmem>>, vector<32x128xf32>
    tpu.vector_store %arg8[%c0_19, %c0_20], %31 {strides = array<i32>} : memref<32x128xf32, #tpu.memory_space<vmem>>, vector<32x128xf32>,
    return
  }
  func.func @transform_0(%arg0: i32) -> (i32, i32) {
    %c0_i32 = arith.constant 0 : i32
    %c0_i32_0 = arith.constant 0 : i32
    return %arg0, %c0_i32 : i32, i32
  }
  func.func @transform_1(%arg0: i32) -> (i32, i32) {
    %c0_i32 = arith.constant 0 : i32
    %c0_i32_0 = arith.constant 0 : i32
    %c0_i32_1 = arith.constant 0 : i32
    return %c0_i32, %c0_i32_0 : i32, i32
  }
  func.func @transform_2(%arg0: i32) -> (i32, i32) {
    %c0_i32 = arith.constant 0 : i32
    %c0_i32_0 = arith.constant 0 : i32
    %c0_i32_1 = arith.constant 0 : i32
    return %c0_i32, %c0_i32_0 : i32, i32
  }
  func.func @transform_3(%arg0: i32) -> (i32, i32) {
    %c0_i32 = arith.constant 0 : i32
    %c0_i32_0 = arith.constant 0 : i32
    %c0_i32_1 = arith.constant 0 : i32
    return %c0_i32, %c0_i32_0 : i32, i32
  }
  func.func @transform_4(%arg0: i32) -> (i32, i32) {
    %c0_i32 = arith.constant 0 : i32
    %c0_i32_0 = arith.constant 0 : i32
    %c0_i32_1 = arith.constant 0 : i32
    return %c0_i32, %c0_i32_0 : i32, i32
  }
  func.func @transform_5(%arg0: i32) -> (i32, i32) {
    %c0_i32 = arith.constant 0 : i32
    %c0_i32_0 = arith.constant 0 : i32
    %c0_i32_1 = arith.constant 0 : i32
    return %c0_i32, %c0_i32_0 : i32, i32
  }
  func.func @transform_6(%arg0: i32) -> (i32, i32) {
    %c0_i32 = arith.constant 0 : i32
    %c0_i32_0 = arith.constant 0 : i32
    %c0_i32_1 = arith.constant 0 : i32
    return %c0_i32, %c0_i32_0 : i32, i32
  }
  func.func @transform_7(%arg0: i32) -> (i32, i32) {
    %c0_i32 = arith.constant 0 : i32
    %c0_i32_0 = arith.constant 0 : i32
    return %arg0, %c0_i32 : i32, i32
  }
}

</mosaic_0001>

<bundles_post_ra>
// kernel: tpu_custom_call.1
= control target key start
LH: loop header
LB: loop body
LE: loop exit
PB: predicated region body
PF: predicated region fallthrough
CT: control target
= control target key end

     0   :  { %s1611_s0 = inlined_call_operand.hbm [shape: bf16[64,128], index: 0, kind: input, shape index: {}]   ;;  %s1612_s1 = inlined_call_operand.hbm [shape: bf16[128,128], index: 1, kind: input, shape index: {}]   ;;  %s1613_s2 = inlined_call_operand.vmem [shape: f32[1,128], index: 2, kind: input, shape index: {}]   ;;  %s1614_s3 = inlined_call_operand.hbm [shape: bf16[128,128], index: 3, kind: input, shape index: {}]   ;;  %s1615_s4 = inlined_call_operand.vmem [shape: f32[1,128], index: 4, kind: input, shape index: {}]   ;;  %s1616_s5 = inlined_call_operand.hbm [shape: bf16[128,128], index: 5, kind: input, shape index: {}]   ;;  %s1617_s6 = inlined_call_operand.vmem [shape: f32[1,128], index: 6, kind: input, shape index: {}]   ;;  %s1618_s7 = inlined_call_operand.hbm [shape: f32[64,128], index: 7, kind: output, shape index: {}]  }
   0x1   :  { %1625 = sst [smem:[#allocation15_spill]] %s1612_s1 }
   0x2   :  { %12 = vsyncpa [#allocation3], 0 }
   0x3   :  { %14 = vsyncpa [#allocation3 + $0x1], 0 }
   0x4   :  { %15 = vsyncpa [#allocation6], 0 }
   0x5   :  { %16 = vsyncpa [#allocation9], 0 }
   0x6   :  { %17 = vsyncpa [#allocation4], 0 }
   0x7   :  { %19 = vsyncpa [#allocation4 + $0x1], 0  ;;  %s1385_s24 = smov 0   ;;  %s1387_s25 = smov 0  }
   0x8   :  { %s1389_s26 = smov 0   ;;  %s1391_s27 = smov 0  }
   0x9 LB: > { %s1406_s28 = sadd.s32 4294967295, %s1334_s27   ;;  %s892_s29 = sadd.s32 4294967294, %s1334_s27   ;;  %s1334_s27 = sphi %s1391_s27, %s1647_s27   ;;  %s1330_s26 = sphi %s1389_s26, %s1646_s26   ;;  %s1326_s25 = sphi %s1387_s25, %s1645_s25   ;;  %s1322_s24 = sphi %s1385_s24, %s1644_s24  }
   0xa   : > { %p45_p0 = scmp.ne.s32.totalorder %s1326_s25, %s1322_s24  ;;  %p1619_p1 = scmp.eq.s32.totalorder %s1406_s28, 0 }
   0xb   : > { %p195_p2 = scmp.eq.s32.totalorder %s1406_s28, 1  ;;  %p201_p3 = scmp.eq.s32.totalorder %s892_s29, 1 }
   0xc   : > { %p1415_p4 = por %p1619_p1, %p45_p0  ;;  %p893_p5 = scmp.ge.s32.totalorder %s1334_s27, 1 }
   0xd   : > { %p1420_p6 = por %p201_p3, %p45_p0  ;;  %p208_p7 = scmp.lt.s32.totalorder %s1334_s27, 3 }
   0xe   : > { %s1626_s30 = scalar_select %p1415_p4, 1, 0 }
   0xf   : > { %s1627_s8 = scalar_select %p1420_p6, 1, 0 }
  0x10   : > { %p1425_p8 = pnand %p893_p5, %p208_p7  ;;  %s1336_s10 = smov [#allocation5]  }
  0x11   : > { %s220_s11 = sshll.u32 %s1336_s10, 4  ;;  %s1337_s13 = smov [#allocation7]   ;;  %s221_s11 = int_to_ptr.vmem [resolvable:$true] %s220_s11 }
  0x12   : > { %s1628_s9 = scalar_select %p1425_p8, 1, 0 }
  0x13   : > { %p1049_p9 = pneg %p1425_p8  ;;  %s236_s14 = sshll.u32 %s1337_s13, 4  ;;  %s237_s14 = int_to_ptr.vmem [resolvable:$true] %s236_s14 }
  0x14   : > { %s1338_s15 = smov [#allocation8]   ;;  %s1167_s17 = scalar_lea.vmem %s221_s11, 1024 }
  0x15   : > { %p1434_p11 = pnand %p1049_p9, %p1619_p1  ;;  %s252_s16 = sshll.u32 %s1338_s15, 4  ;;  %s253_s16 = int_to_ptr.vmem [resolvable:$true] %s252_s16 }
  0x16   : > { %p1168_p13 = scmp.ne.s32.totalorder %s221_s11, %s1167_s17  ;;  %p1175_p5 = scmp.lt.s32.totalorder %s221_s11, %s221_s11 }
  0x17   : > { %p1158_p12 = pneg %p1434_p11  ;;  %p1176_p7 = scmp.lt.s32.totalorder %s1167_s17, %s1167_s17 }
  0x19   : > { %p1170_p0 = pnand %p1168_p13, %p1158_p12  ;;  %p1177_p9 = por %p1176_p7, %p1175_p5 }
  0x1b   : > { %p1171_p3 = pneg %p1170_p0 }
  0x1d   : > { %p1178_p10 = pnand %p1177_p9, %p1171_p3 }
  0x1f   : > { %1181 = shalt.err (!%p1178_p10)
}
  0x20   : > { %s1620_s18 = smov 64   ;;  %s1621_s19 = smov 4  }
  0x21   : > { %s1630_s1 = sld [smem:[#allocation15_spill]]  ;;  %s1193_s22 = scalar_lea.vmem %s237_s14, 1024 }
  0x22   : > { %p1194_p13 = scmp.ne.s32.totalorder %s237_s14, %s1193_s22  ;;  %p1201_p3 = scmp.lt.s32.totalorder %s237_s14, %s237_s14 }
  0x23   : > { %p1202_p10 = scmp.lt.s32.totalorder %s1193_s22, %s1193_s22 }
  0x24   : > { %p1196_p0 = pnand %p1194_p13, %p1158_p12 }
  0x25   : > { %p1203_p7 = por %p1202_p10, %p1201_p3 }
  0x26   : > { %p1197_p5 = pneg %p1196_p0 }
  0x27   : > { %1052 = dma.hbm_to_vmem [thread:$0]  (!%p1434_p11), %s1630_s1, 1024, %s221_s11, [#allocation6], %s1620_s18, %s1620_s18, %s1621_s19  }
  0x28   : > { %p1204_p9 = pnand %p1203_p7, %p1197_p5 }
  0x2a   : > { %1207 = shalt.err (!%p1204_p9)
}
  0x2b   : > { %1055 = dma.hbm_to_vmem [thread:$0]  (!%p1434_p11), %s1614_s3, 1024, %s237_s14, [#allocation6], %s1620_s18, %s1620_s18, %s1621_s19  }
  0x2c   : > { %s1219_s10 = scalar_lea.vmem %s253_s16, 1024  ;;  %p1227_p3 = scmp.lt.s32.totalorder %s253_s16, %s253_s16 }
  0x2d   : > { %p1220_p1 = scmp.ne.s32.totalorder %s253_s16, %s1219_s10  ;;  %p1228_p5 = scmp.lt.s32.totalorder %s1219_s10, %s1219_s10 }
  0x2f   : > { %p1222_p13 = pnand %p1220_p1, %p1158_p12  ;;  %p1229_p10 = por %p1228_p5, %p1227_p3 }
  0x31   : > { %p1223_p0 = pneg %p1222_p13 }
  0x33   : > { %p1230_p7 = pnand %p1229_p10, %p1223_p0 }
  0x35   : > { %1233 = shalt.err (!%p1230_p7)
}
  0x36   : > { %1058 = dma.hbm_to_vmem [thread:$0]  (!%p1434_p11), %s1616_s5, 1024, %s253_s16, [#allocation9], %s1620_s18, %s1620_s18, %s1621_s19  }
  0x37   : > { %s1474_s14 = sadd.s32 1, %s1334_s27   ;;  %s32_s15 = sadd.s32 1, %s1330_s26 }
  0x38   : > { %s29_s12 = ssub.s32 %s1334_s27, %s1474_s14  ;;  %p39_p12 = scmp.ne.s32.totalorder %s1330_s26, %s1326_s25 }
  0x39   : > { %p30_p1 = scmp.eq.s32.totalorder %s29_s12, 0  ;;  %p40_p9 = scmp.eq.s32.totalorder %s1334_s27, 0 }
  0x3a   : > { %p1070_p13 = scmp.lt.s32.totalorder %s1334_s27, 2  ;;  %p1488_p3 = por %p195_p2, %p39_p12 }
  0x3b   : > { %s1484_s17 = scalar_select %p30_p1, %s1330_s26, %s32_s15  }
  0x3c   : > { %p41_p0 = por %p40_p9, %p39_p12  ;;  %s269_s21 = sand.u32 1, %s1330_s26  }
  0x3d   : > { %s1631_s20 = scalar_select %p1488_p3, 1, 0 }
  0x3e   : > { %s941_s22 = sshll.u32 %s1334_s27, 8  ;;  %s898_s16 = sshll.u32 %s269_s21, 4 }
  0x3f   : > { %s1497_s10 = scalar_lea.hbm %s1611_s0, %s941_s22  ;;  %s273_s11 = scalar_lea.vmem [#allocation2], %s898_s16 }
  0x40   : > { %s280_s13 = sshll.u32 %s273_s11, 4  ;;  %p1499_p11 = pnand %p1070_p13, %p41_p0  ;;  %s1503_s13 = int_to_ptr.vmem [resolvable:$true] %s280_s13 }
  0x41   : > { %s1505_s15 = scalar_lea.sflag [#allocation3], %s269_s21  ;;  %s1234_s18 = scalar_lea.hbm %s1497_s10, 256 }
  0x42   : > { %p1235_p2 = scmp.ne.s32.totalorder %s1497_s10, %s1234_s18  ;;  %p1236_p5 = pneg %p1499_p11 }
  0x43   : > { %s1239_s16 = scalar_lea.hbm %s1611_s0, 512  ;;  %p1240_p1 = scmp.lt.s32.totalorder %s1497_s10, %s1611_s0 }
  0x44   : > { %p1237_p10 = pnand %p1236_p5, %p1235_p2  ;;  %p1241_p12 = scmp.lt.s32.totalorder %s1239_s16, %s1234_s18 }
  0x46   : > { %p1238_p7 = pneg %p1237_p10  ;;  %p1242_p9 = por %p1241_p12, %p1240_p1 }
  0x48   : > { %p1243_p13 = pnand %p1242_p9, %p1238_p7 }
  0x4a   : > { %1246 = shalt.err (!%p1243_p13)
}
  0x4b   : > { %s1247_s21 = scalar_lea.vmem %s1503_s13, 256  ;;  %s1341_s19 = smov [#allocation2]  }
  0x4c   : > { %p1248_p0 = scmp.ne.s32.totalorder %s1503_s13, %s1247_s21  ;;  %s1252_s1 = sshll.u32 %s1341_s19, 4  ;;  %s1253_s1 = int_to_ptr.vmem [resolvable:$false] %s1252_s1 }
  0x4d   : > { %s1254_s22 = scalar_lea.vmem %s1253_s1, 512  ;;  %p1255_p10 = scmp.lt.s32.totalorder %s1503_s13, %s1253_s1 }
  0x4e   : > { %p1250_p6 = pnand %p1248_p0, %p1236_p5  ;;  %p1256_p3 = scmp.lt.s32.totalorder %s1254_s22, %s1247_s21 }
  0x50   : > { %p1251_p2 = pneg %p1250_p6  ;;  %p1257_p4 = por %p1256_p3, %p1255_p10 }
  0x52   : > { %p1258_p8 = pnand %p1257_p4, %p1251_p2 }
  0x54   : > { %1261 = shalt.err (!%p1258_p8)
}
  0x55   : > { %s1633_s18 = smov 4   ;;  %s1634_s23 = smov 64  }
  0x56   : > { %1062 = dma.hbm_to_vmem [thread:$0]  (!%p1499_p11), %s1497_s10, 256, %s1503_s13, %s1505_s15, %s1634_s23, %s1634_s23, %s1633_s18  }
  0x57   : > { %p1635_p6 = scmp.ne.s32.totalorder %s1628_s9, 0 }
  0x58   : > { %s1532_s19 = sand.u32 (!%p1635_p6), 1, %s1326_s25   ;;  %p1636_p4 = scmp.ne.s32.totalorder (!%p1635_p6), %s1626_s30, 0 }
  0x59   : > { %292 = sbr.rel (%p1635_p6) target bundleno = 1078 (0x436), region = 48  ;;  %s902_s1 = sshll.u32 (!%p1635_p6), %s1532_s19, 4 }
  0x5a   : > { %s295_s16 = scalar_lea.sflag (!%p1635_p6), [#allocation3], %s1532_s19  ;;  %s1536_s29 = scalar_lea.vmem (!%p1635_p6), [#allocation2], %s902_s1 }
  0x5e   : > { %1305 = dma.done.wait (%p1636_p4), %s295_s16, 256  }
  0x5f   : > { %1307 = vsyncadd (%p1636_p4), %s295_s16, 4294967040  ;;  %p1637_p8 = scmp.eq.s32.totalorder %s1406_s28, 0 }
  0x61   : > { %1309 = dma.done.wait (%p1637_p8), [#allocation6], 2048   ;;  %p1638_p3 = pmov %p1637_p8 }
  0x63   : > { %1311 = vsyncadd (%p1638_p3), [#allocation6], 4294965248  ;;  %p1639_p11 = pmov %p1638_p3 }
  0x64   : > { %p1640_p5 = pmov %p1638_p3 }
  0x65   : > { %1313 = dma.done.wait (%p1639_p11), [#allocation9], 1024  }
  0x66   : > { %1315 = vsyncadd (%p1640_p5), [#allocation9], 4294966272  ;;  %v1114_v0 = vld [vmem:[#allocation5 + $0x38] sm:$0xff]   ;;  %v1115_v1 = vld [vmem:[#allocation5 + $0x30] sm:$0xff]   ;;  %s906_s11 = sshll.u32 %s1532_s19, 5  ;;  %s942_s18 = sshll.u32 %s1406_s28, 9 }
  0x67   : > { %973 = vmatprep.subr.bf16.mxu0 %v1114_v0  ;;  %v1116_v2 = vld [vmem:[#allocation5 + $0x28] sm:$0xff]   ;;  %v1117_v3 = vld [vmem:[#allocation5 + $0x20] sm:$0xff]   ;;  %v1124_v5 = vld [vmem:[#allocation7 + $0x38] sm:$0xff]   ;;  %s340_s21 = scalar_lea.vmem [#allocation10], %s906_s11  ;;  %s1568_s16 = scalar_lea.hbm %s1618_s7, %s942_s18 }
  0x68   : > { %974 = vmatpush3.bf16.msra.mxu0 %v1114_v0  ;;  %v1122_v4 = vld [vmem:[%s1536_s29] sm:$0xff]   ;;  %v1118_v7 = vld [vmem:[#allocation5 + $0x18] sm:$0xff]   ;;  %993 = vmatprep.subr.bf16.mxu1 %v1124_v5  ;;  %v1126_v9 = vld [vmem:[#allocation7 + $0x28] sm:$0xff]   ;;  %s790_s22 = sshll.u32 %s340_s21, 4  ;;  %p1641_p1 = scmp.ne.s32.totalorder %s1631_s20, 0  ;;  %s1563_s22 = int_to_ptr.vmem [resolvable:$true] %s790_s22 }
  0x69   : > { %975 = vmatprep.subr.bf16.mxu0 %v1115_v1  ;;  %989 = vmatprep.mubr.bf16.mxu0 %v1122_v4  ;;  %v1125_v6 = vld [vmem:[#allocation7 + $0x30] sm:$0xff]   ;;  %v1127_v10 = vld [vmem:[#allocation7 + $0x20] sm:$0xff]   ;;  %v1120_v11 = vld [vmem:[#allocation5 + $0x8] sm:$0xff]   ;;  %s1262_s30 = scalar_lea.vmem %s1563_s22, 512  ;;  %s1342_s28 = smov [#allocation10]  }
  0x6a   : > { %994 = vmatpush3.bf16.msra.mxu1 %v1124_v5  ;;  %v1119_v8 = vld [vmem:[#allocation5 + $0x10] sm:$0xff]   ;;  %v1128_v12 = vld [vmem:[#allocation7 + $0x18] sm:$0xff]   ;;  %v1121_v13 = vld [vmem:[#allocation5] sm:$0xff]   ;;  %p1263_p7 = scmp.ne.s32.totalorder %s1563_s22, %s1262_s30  ;;  %s1266_s9 = sshll.u32 %s1342_s28, 4  ;;  %s1267_s9 = int_to_ptr.vmem [resolvable:$false] %s1266_s9 }
  0x6b   : > { %995 = vmatprep.subr.bf16.mxu1 %v1125_v6  ;;  %v1123_v14 = vld [vmem:[%s1536_s29 + $0x8] sm:$0xff]   ;;  %v1129_v15 = vld [vmem:[#allocation7 + $0x10] sm:$0xff]   ;;  %v1131_v17 = vld [vmem:[#allocation7] sm:$0xff]   ;;  %s777_s29 = scalar_lea.sflag [#allocation4], %s1532_s19  ;;  %s1268_s10 = scalar_lea.vmem %s1267_s9, 1024 }
  0x6c   : > { %976 = vmatpush3.bf16.msra.mxu0 %v1115_v1  ;;  %v1130_v16 = vld [vmem:[#allocation7 + $0x8] sm:$0xff]   ;;  %v1132_v18 = vld [vmem:[#allocation8 + $0x38] sm:$0xff]   ;;  %v1133_v19 = vld [vmem:[#allocation8 + $0x30] sm:$0xff]   ;;  %p1264_p12 = pnand %p1263_p7, %p1641_p1  ;;  %p1269_p13 = scmp.lt.s32.totalorder %s1563_s22, %s1267_s9 }
  0x6d   : > { %977 = vmatprep.subr.bf16.mxu0 %v1116_v2  ;;  %v1134_v20 = vld [vmem:[#allocation8 + $0x28] sm:$0xff]   ;;  %v1135_v21 = vld [vmem:[#allocation8 + $0x20] sm:$0xff]   ;;  %v1136_v22 = vld [vmem:[#allocation8 + $0x18] sm:$0xff]   ;;  %p1270_p0 = scmp.lt.s32.totalorder %s1268_s10, %s1262_s30 }
  0x6e   : > { %996 = vmatpush3.bf16.msra.mxu1 %v1125_v6  ;;  %v907_v25 = vld [vmem:[%s1613_s2] ss:$0 sm:$0xff]  ;;  %v1137_v38 = vld [vmem:[#allocation8 + $0x10] sm:$0xff]   ;;  %v1138_v39 = vld [vmem:[#allocation8 + $0x8] sm:$0xff]   ;;  %p1265_p9 = pneg %p1264_p12 }
  0x6f   : > { %997 = vmatprep.subr.bf16.mxu1 %v1126_v9  ;;  %v1139_v40 = vld [vmem:[#allocation8] sm:$0xff]   ;;  %p1271_p2 = por %p1270_p0, %p1269_p13 }
  0x70   : > { %978 = vmatpush3.bf16.msra.mxu0 %v1116_v2  ;;  %v918_v43 = vld [vmem:[%s1615_s4] ss:$0 sm:$0xff] }
  0x71   : > { %979 = vmatprep.subr.bf16.mxu0 %v1117_v3  ;;  %v927_v56 = vld [vmem:[%s1617_s6] ss:$0 sm:$0xff]  ;;  %p1272_p10 = pnand %p1271_p2, %p1265_p9 }
  0x72   : > { %998 = vmatpush3.bf16.msra.mxu1 %v1126_v9 }
  0x73   : > { %999 = vmatprep.subr.bf16.mxu1 %v1127_v10 }
  0x74   : > { %980 = vmatpush3.bf16.msra.mxu0 %v1117_v3 }
  0x75   : > { %981 = vmatprep.subr.bf16.mxu0 %v1118_v7 }
  0x76   : > { %1000 = vmatpush3.bf16.msra.mxu1 %v1127_v10 }
  0x77   : > { %1001 = vmatprep.subr.bf16.mxu1 %v1128_v12 }
  0x78   : > { %982 = vmatpush3.bf16.msra.mxu0 %v1118_v7 }
  0x79   : > { %983 = vmatprep.subr.bf16.mxu0 %v1119_v8 }
  0x7a   : > { %1002 = vmatpush3.bf16.msra.mxu1 %v1128_v12 }
  0x7b   : > { %1003 = vmatprep.subr.bf16.mxu1 %v1129_v15 }
  0x7c   : > { %984 = vmatpush3.bf16.msra.mxu0 %v1119_v8 }
  0x7d   : > { %985 = vmatprep.subr.bf16.mxu0 %v1120_v11 }
  0x7e   : > { %1004 = vmatpush3.bf16.msra.mxu1 %v1129_v15 }
  0x7f   : > { %1005 = vmatprep.subr.bf16.mxu1 %v1130_v16 }
  0x80   : > { %986 = vmatpush3.bf16.msra.mxu0 %v1120_v11 }
  0x81   : > { %987 = vmatprep.subr.bf16.mxu0 %v1121_v13 }
  0x82   : > { %1006 = vmatpush3.bf16.msra.mxu1 %v1130_v16 }
  0x83   : > { %1007 = vmatprep.subr.bf16.mxu1 %v1131_v17 }
  0x84   : > { %988 = vmatpush3.bf16.msra.mxu0 %v1121_v13 }
  0x85   : > { %1013 = vmatprep.subr.bf16.mxu0 %v1132_v18 }
  0x86   : > { %1008 = vmatpush3.bf16.msra.mxu1 %v1131_v17 }
  0x87   : > { %990 = vmatmul.mubr.bf16.vlgmr.msra.gmra.mxu0 %v1123_v14 }
  0x88   : > { %1014 = vmatpush3.bf16.msra.mxu0 %v1132_v18 }
  0x89   : > { %1015 = vmatprep.subr.bf16.mxu0 %v1133_v19 }
  0x8c   : > { %1016 = vmatpush3.bf16.msra.mxu0 %v1133_v19 }
  0x8d   : > { %1017 = vmatprep.subr.bf16.mxu0 %v1134_v20 }
  0x90   : > { %1018 = vmatpush3.bf16.msra.mxu0 %v1134_v20 }
  0x91   : > { %1019 = vmatprep.subr.bf16.mxu0 %v1135_v21 }
  0x94   : > { %1020 = vmatpush3.bf16.msra.mxu0 %v1135_v21 }
  0x95   : > { %1021 = vmatprep.subr.bf16.mxu0 %v1136_v22 }
  0x98   : > { %1022 = vmatpush3.bf16.msra.mxu0 %v1136_v22 }
  0x99   : > { %1023 = vmatprep.subr.bf16.mxu0 %v1137_v38 }
  0x9c   : > { %1024 = vmatpush3.bf16.msra.mxu0 %v1137_v38 }
  0x9d   : > { %1025 = vmatprep.subr.bf16.mxu0 %v1138_v39 }
  0xa0   : > { %1026 = vmatpush3.bf16.msra.mxu0 %v1138_v39 }
  0xa1   : > { %1027 = vmatprep.subr.bf16.mxu0 %v1139_v40 }
  0xa4   : > { %1028 = vmatpush3.bf16.msra.mxu0 %v1139_v40 }
 0x147   : > { %v991_v23 = vpop.f32.mrf.mxu0 }
 0x148   : > { %v474_v29 = vadd.f32 %v991_v23, %v907_v25 }
 0x149   : > { %v465_v24 = vpop.f32.mrf.mxu0 }
 0x14a   : > { %v466_v27 = vadd.f32 %v907_v25, %v465_v24  ;;  %v482_v35 = vmax.f32 %v474_v29, 0.0 }
 0x14b   : > { %v992_v26 = vpop.f32.mrf.mxu0 }
 0x14c   : > { %v477_v28 = vadd.f32 %v992_v26, %v907_v25  ;;  %v480_v33 = vmax.f32 %v466_v27, 0.0 }
 0x14d   : > { %v468_v30 = vpop.f32.mrf.mxu0 }
 0x14e   : > { %v469_v31 = vadd.f32 %v907_v25, %v468_v30  ;;  %v483_v32 = vmax.f32 %v477_v28, 0.0 }
 0x150   : > { %v481_v34 = vmax.f32 %v469_v31, 0.0  ;;  %v485_v37 = vpack.c.bf16 %v483_v32, %v482_v35 }
 0x152   : > { %v484_v36 = vpack.c.bf16 %v481_v34, %v480_v33 }
 0x154   : > { %1009 = vmatprep.mubr.bf16.mxu1 %v484_v36 }
 0x155   : > { %1010 = vmatmul.mubr.bf16.vlgmr.msra.gmra.mxu1 %v485_v37 }
 0x215   : > { %v1011_v41 = vpop.f32.mrf.mxu1 }
 0x216   : > { %v600_v47 = vadd.f32 %v1011_v41, %v918_v43 }
 0x217   : > { %v591_v42 = vpop.f32.mrf.mxu1 }
 0x218   : > { %v592_v45 = vadd.f32 %v918_v43, %v591_v42  ;;  %v608_v53 = vmax.f32 %v600_v47, 0.0 }
 0x219   : > { %v1012_v44 = vpop.f32.mrf.mxu1 }
 0x21a   : > { %v603_v46 = vadd.f32 %v1012_v44, %v918_v43  ;;  %v606_v51 = vmax.f32 %v592_v45, 0.0 }
 0x21b   : > { %v594_v48 = vpop.f32.mrf.mxu1 }
 0x21c   : > { %v595_v49 = vadd.f32 %v918_v43, %v594_v48  ;;  %v609_v50 = vmax.f32 %v603_v46, 0.0 }
 0x21e   : > { %v607_v52 = vmax.f32 %v595_v49, 0.0  ;;  %v611_v55 = vpack.c.bf16 %v609_v50, %v608_v53 }
 0x220   : > { %v610_v54 = vpack.c.bf16 %v607_v52, %v606_v51 }
 0x222   : > { %1029 = vmatprep.mubr.bf16.mxu0 %v610_v54 }
 0x223   : > { %1030 = vmatmul.mubr.bf16.vlgmr.msra.gmra.mxu0 %v611_v55 }
 0x2e3   : > { %v1031_v57 = vpop.f32.mrf.mxu0 }
 0x2e4   : > { %v726_v58 = vadd.f32 %v1031_v57, %v927_v56 }
 0x2e5   : > { %v717_v59 = vpop.f32.mrf.mxu0 }
 0x2e6   : > { %v718_v60 = vadd.f32 %v927_v56, %v717_v59  ;;  %736 = vmax.xlane.f32.xlu1 %v726_v58 }
 0x2e7   : > { %v1032_v61 = vpop.f32.mrf.mxu0 }
 0x2e8   : > { %v729_v62 = vadd.f32 %v1032_v61, %v927_v56  ;;  %732 = vmax.xlane.f32.xlu0 %v718_v60 }
 0x2e9   : > { %v720_v63 = vpop.f32.mrf.mxu0 }
 0x2ea   : > { %v721_v0 = vadd.f32 %v927_v56, %v720_v63  ;;  %738 = vmax.xlane.f32.xlu1 %v729_v62 }
 0x2ec   : > { %734 = vmax.xlane.f32.xlu0 %v721_v0 }
 0x36f   : > { %v737_v1 = vpop.xlane.xlu1 %736 }
 0x370   : > { %v742_v2 = vsub.f32 %v726_v58, %v737_v1 }
 0x371   : > { %v733_v3 = vpop.xlane.xlu0 %732 }
 0x372   : > { %v740_v4 = vsub.f32 %v718_v60, %v733_v3  ;;  %v748_v7 = vmul.f32 1.442695, %v742_v2 }
 0x373   : > { %v739_v5 = vpop.xlane.xlu1 %738 }
 0x374   : > { %v744_v6 = vmul.f32 1.442695, %v740_v4  ;;  %v743_v9 = vsub.f32 %v729_v62, %v739_v5 }
 0x375   : > { %v735_v8 = vpop.xlane.xlu0 %734 }
 0x376   : > { %1140 = vpow2.f32 %v744_v6  ;;  %v741_v10 = vsub.f32 %v721_v0, %v735_v8  ;;  %v750_v12 = vmul.f32 1.442695, %v743_v9 }
 0x377   : > { %1142 = vpow2.f32 %v748_v7 }
 0x378   : > { %v746_v11 = vmul.f32 1.442695, %v741_v10 }
 0x37a   : > { %1144 = vpow2.f32 %v746_v11 }
 0x37b   : > { %1146 = vpow2.f32 %v750_v12 }
 0x383   : > { %v1141_v13 = vpop.eup %1140 }
 0x384   : > { %752 = vadd.xlane.f32.xlu0 %v1141_v13  ;;  %v1143_v14 = vpop.eup %1142 }
 0x387   : > { %v1145_v15 = vpop.eup %1144 }
 0x388   : > { %756 = vadd.xlane.f32.xlu0 %v1143_v14  ;;  %754 = vadd.xlane.f32.xlu1 %v1145_v15  ;;  %v1147_v16 = vpop.eup %1146 }
 0x38c   : > { %758 = vadd.xlane.f32.xlu1 %v1147_v16 }
 0x40d   : > { %v753_v17 = vpop.xlane.xlu0 %752 }
 0x40e   : > { %1148 = vlog2.f32 %v753_v17 }
 0x411   : > { %v755_v18 = vpop.xlane.xlu1 %754  ;;  %v757_v19 = vpop.xlane.xlu0 %756 }
 0x412   : > { %1150 = vlog2.f32 %v755_v18 }
 0x413   : > { %1152 = vlog2.f32 %v757_v19 }
 0x415   : > { %v759_v20 = vpop.xlane.xlu1 %758 }
 0x416   : > { %1154 = vlog2.f32 %v759_v20 }
 0x41b   : > { %v1149_v21 = vpop.eup %1148 }
 0x41c   : > { %v761_v22 = vmul.f32 0.6931472, %v1149_v21 }
 0x41e   : > { %v768_v23 = vsub.f32 %v740_v4, %v761_v22 }
 0x41f   : > { %v1151_v24 = vpop.eup %1150 }
 0x420   : > { %v1153_v25 = vpop.eup %1152  ;;  %772 = vst [vmem:[%s340_s21] sm:$0xff] %v768_v23  ;;  %v763_v26 = vmul.f32 0.6931472, %v1151_v24 }
 0x421   : > { %v765_v27 = vmul.f32 0.6931472, %v1153_v25 }
 0x422   : > { %v769_v28 = vsub.f32 %v741_v10, %v763_v26 }
 0x423   : > { %v1155_v29 = vpop.eup %1154  ;;  %v770_v30 = vsub.f32 %v742_v2, %v765_v27 }
 0x424   : > { %773 = vst [vmem:[%s340_s21 + $0x8] sm:$0xff] %v769_v28  ;;  %v767_v31 = vmul.f32 0.6931472, %v1155_v29 }
 0x425   : > { %774 = vst [vmem:[%s340_s21 + $0x10] sm:$0xff] %v770_v30 }
 0x426   : > { %v771_v32 = vsub.f32 %v743_v9, %v767_v31 }
 0x428   : > { %775 = vst [vmem:[%s340_s21 + $0x18] sm:$0xff] %v771_v32 }
 0x429   : > { %1275 = shalt.err (!%p1272_p10)
}
 0x42a   : > { %s1276_s13 = scalar_lea.hbm %s1568_s16, 512  ;;  %s1280_s11 = scalar_lea.hbm %s1618_s7, 1024 }
 0x42b   : > { %p1277_p6 = scmp.ne.s32.totalorder %s1568_s16, %s1276_s13  ;;  %p1281_p3 = scmp.lt.s32.totalorder %s1568_s16, %s1618_s7 }
 0x42c   : > { %p1282_p11 = scmp.lt.s32.totalorder %s1280_s11, %s1276_s13 }
 0x42d   : > { %p1278_p4 = pnand %p1277_p6, %p1641_p1 }
 0x42e   : > { %p1283_p5 = por %p1282_p11, %p1281_p3 }
 0x42f   : > { %p1279_p8 = pneg %p1278_p4 }
 0x431   : > { %p1284_p7 = pnand %p1283_p5, %p1279_p8 }
 0x433   : > { %1287 = shalt.err (!%p1284_p7)
}
 0x434   : > { %s1343_s23 = smov 128   ;;  %s1344_s1 = smov 8  }
 0x435   : > { %1047 = dma.vmem_to_hbm [thread:$0]  (%p1641_p1), %s1563_s22, 512, %s1568_s16, %s777_s29, %s1343_s23, %s1343_s23, %s1344_s1  }
 0x436 PF: > { %s805_s30 = sand.u32 1, %s1322_s24   ;;  %p1642_p12 = scmp.ne.s32.totalorder %s1627_s8, 0 }
 0x437   : > { %p1643_p9 = scmp.ge.s32.totalorder %s1334_s27, 2  ;;  %s806_s28 = scalar_lea.sflag [#allocation4], %s805_s30 }
 0x439   : > { %p1064_p13 = pnand %p1643_p9, %p1642_p12 }
 0x43b   : > { %p1065_p0 = pneg %p1064_p13 }
 0x43d   : > { %1317 = dma.done.wait (%p1065_p0), %s806_s28, 512  }
 0x43e   : > { %1319 = vsyncadd (%p1065_p0), %s806_s28, 4294966784  ;;  %p22_p2 = scmp.ge.s32.totalorder %s1474_s14, 4   ;;  %s1644_s24 = smov %s1326_s25 }
 0x43f   : > { %s1645_s25 = smov %s1330_s26  ;;  %s1646_s26 = smov %s1484_s17 }
 0x440   : > { %s1647_s27 = smov %s1474_s14  ;;  %24 = sbr.rel (!%p22_p2) target bundleno = 9 (0x9), region = 105 }
 0x445   :  { %811 = vsyncpa [#allocation3], 1 }
 0x446   :  { %813 = vsyncpa [#allocation3 + $0x1], 1 }
 0x447   :  { %814 = vsyncpa [#allocation6], 1 }
 0x448   :  { %815 = vsyncpa [#allocation9], 1 }
 0x449   :  { %816 = vsyncpa [#allocation4], 1 }
 0x44a   :  { %818 = vsyncpa [#allocation4 + $0x1], 1 }

// kernel: tpu_custom_call.1
= control target key start
LH: loop header
LB: loop body
LE: loop exit
PB: predicated region body
PF: predicated region fallthrough
CT: control target
= control target key end

     0   :  { %s1611_s0 = inlined_call_operand.hbm [shape: bf16[64,128], index: 0, kind: input, shape index: {}]   ;;  %s1612_s1 = inlined_call_operand.hbm [shape: bf16[128,128], index: 1, kind: input, shape index: {}]   ;;  %s1613_s2 = inlined_call_operand.vmem [shape: f32[1,128], index: 2, kind: input, shape index: {}]   ;;  %s1614_s3 = inlined_call_operand.hbm [shape: bf16[128,128], index: 3, kind: input, shape index: {}]   ;;  %s1615_s4 = inlined_call_operand.vmem [shape: f32[1,128], index: 4, kind: input, shape index: {}]   ;;  %s1616_s5 = inlined_call_operand.hbm [shape: bf16[128,128], index: 5, kind: input, shape index: {}]   ;;  %s1617_s6 = inlined_call_operand.vmem [shape: f32[1,128], index: 6, kind: input, shape index: {}]   ;;  %s1618_s7 = inlined_call_operand.hbm [shape: f32[64,128], index: 7, kind: output, shape index: {}]  }
   0x1   :  { %1625 = sst [smem:[#allocation15_spill]] %s1612_s1 }
   0x2   :  { %12 = vsyncpa [#allocation3], 0 }
   0x3   :  { %14 = vsyncpa [#allocation3 + $0x1], 0 }
   0x4   :  { %15 = vsyncpa [#allocation6], 0 }
   0x5   :  { %16 = vsyncpa [#allocation9], 0 }
   0x6   :  { %17 = vsyncpa [#allocation4], 0 }
   0x7   :  { %19 = vsyncpa [#allocation4 + $0x1], 0  ;;  %s1385_s24 = smov 0   ;;  %s1387_s25 = smov 0  }
   0x8   :  { %s1389_s26 = smov 0   ;;  %s1391_s27 = smov 0  }
   0x9 LB: > { %s1406_s28 = sadd.s32 4294967295, %s1334_s27   ;;  %s892_s29 = sadd.s32 4294967294, %s1334_s27   ;;  %s1334_s27 = sphi %s1391_s27, %s1647_s27   ;;  %s1330_s26 = sphi %s1389_s26, %s1646_s26   ;;  %s1326_s25 = sphi %s1387_s25, %s1645_s25   ;;  %s1322_s24 = sphi %s1385_s24, %s1644_s24  }
   0xa   : > { %p45_p0 = scmp.ne.s32.totalorder %s1326_s25, %s1322_s24  ;;  %p1619_p1 = scmp.eq.s32.totalorder %s1406_s28, 0 }
   0xb   : > { %p195_p2 = scmp.eq.s32.totalorder %s1406_s28, 1  ;;  %p201_p3 = scmp.eq.s32.totalorder %s892_s29, 1 }
   0xc   : > { %p1415_p4 = por %p1619_p1, %p45_p0  ;;  %p893_p5 = scmp.ge.s32.totalorder %s1334_s27, 1 }
   0xd   : > { %p1420_p6 = por %p201_p3, %p45_p0  ;;  %p208_p7 = scmp.lt.s32.totalorder %s1334_s27, 3 }
   0xe   : > { %s1626_s30 = scalar_select %p1415_p4, 1, 0 }
   0xf   : > { %s1627_s8 = scalar_select %p1420_p6, 1, 0 }
  0x10   : > { %p1425_p8 = pnand %p893_p5, %p208_p7  ;;  %s1336_s10 = smov [#allocation5]  }
  0x11   : > { %s220_s11 = sshll.u32 %s1336_s10, 4  ;;  %s1337_s13 = smov [#allocation7]   ;;  %s221_s11 = int_to_ptr.vmem [resolvable:$true] %s220_s11 }
  0x12   : > { %s1628_s9 = scalar_select %p1425_p8, 1, 0 }
  0x13   : > { %p1049_p9 = pneg %p1425_p8  ;;  %s236_s14 = sshll.u32 %s1337_s13, 4  ;;  %s237_s14 = int_to_ptr.vmem [resolvable:$true] %s236_s14 }
  0x14   : > { %s1338_s15 = smov [#allocation8]   ;;  %s1167_s17 = scalar_lea.vmem %s221_s11, 1024 }
  0x15   : > { %p1434_p11 = pnand %p1049_p9, %p1619_p1  ;;  %s252_s16 = sshll.u32 %s1338_s15, 4  ;;  %s253_s16 = int_to_ptr.vmem [resolvable:$true] %s252_s16 }
  0x16   : > { %p1168_p13 = scmp.ne.s32.totalorder %s221_s11, %s1167_s17  ;;  %p1175_p5 = scmp.lt.s32.totalorder %s221_s11, %s221_s11 }
  0x17   : > { %p1158_p12 = pneg %p1434_p11  ;;  %p1176_p7 = scmp.lt.s32.totalorder %s1167_s17, %s1167_s17 }
  0x19   : > { %p1170_p0 = pnand %p1168_p13, %p1158_p12  ;;  %p1177_p9 = por %p1176_p7, %p1175_p5 }
  0x1b   : > { %p1171_p3 = pneg %p1170_p0 }
  0x1d   : > { %p1178_p10 = pnand %p1177_p9, %p1171_p3 }
  0x1f   : > { %1181 = shalt.err (!%p1178_p10)
}
  0x20   : > { %s1620_s18 = smov 64   ;;  %s1621_s19 = smov 4  }
  0x21   : > { %s1630_s1 = sld [smem:[#allocation15_spill]]  ;;  %s1193_s22 = scalar_lea.vmem %s237_s14, 1024 }
  0x22   : > { %p1194_p13 = scmp.ne.s32.totalorder %s237_s14, %s1193_s22  ;;  %p1201_p3 = scmp.lt.s32.totalorder %s237_s14, %s237_s14 }
  0x23   : > { %p1202_p10 = scmp.lt.s32.totalorder %s1193_s22, %s1193_s22 }
  0x24   : > { %p1196_p0 = pnand %p1194_p13, %p1158_p12 }
  0x25   : > { %p1203_p7 = por %p1202_p10, %p1201_p3 }
  0x26   : > { %p1197_p5 = pneg %p1196_p0 }
  0x27   : > { %1052 = dma.hbm_to_vmem [thread:$0]  (!%p1434_p11), %s1630_s1, 1024, %s221_s11, [#allocation6], %s1620_s18, %s1620_s18, %s1621_s19  }
  0x28   : > { %p1204_p9 = pnand %p1203_p7, %p1197_p5 }
  0x2a   : > { %1207 = shalt.err (!%p1204_p9)
}
  0x2b   : > { %1055 = dma.hbm_to_vmem [thread:$0]  (!%p1434_p11), %s1614_s3, 1024, %s237_s14, [#allocation6], %s1620_s18, %s1620_s18, %s1621_s19  }
  0x2c   : > { %s1219_s10 = scalar_lea.vmem %s253_s16, 1024  ;;  %p1227_p3 = scmp.lt.s32.totalorder %s253_s16, %s253_s16 }
  0x2d   : > { %p1220_p1 = scmp.ne.s32.totalorder %s253_s16, %s1219_s10  ;;  %p1228_p5 = scmp.lt.s32.totalorder %s1219_s10, %s1219_s10 }
  0x2f   : > { %p1222_p13 = pnand %p1220_p1, %p1158_p12  ;;  %p1229_p10 = por %p1228_p5, %p1227_p3 }
  0x31   : > { %p1223_p0 = pneg %p1222_p13 }
  0x33   : > { %p1230_p7 = pnand %p1229_p10, %p1223_p0 }
  0x35   : > { %1233 = shalt.err (!%p1230_p7)
}
  0x36   : > { %1058 = dma.hbm_to_vmem [thread:$0]  (!%p1434_p11), %s1616_s5, 1024, %s253_s16, [#allocation9], %s1620_s18, %s1620_s18, %s1621_s19  }
  0x37   : > { %s1474_s14 = sadd.s32 1, %s1334_s27   ;;  %s32_s15 = sadd.s32 1, %s1330_s26 }
  0x38   : > { %s29_s12 = ssub.s32 %s1334_s27, %s1474_s14  ;;  %p39_p12 = scmp.ne.s32.totalorder %s1330_s26, %s1326_s25 }
  0x39   : > { %p30_p1 = scmp.eq.s32.totalorder %s29_s12, 0  ;;  %p40_p9 = scmp.eq.s32.totalorder %s1334_s27, 0 }
  0x3a   : > { %p1070_p13 = scmp.lt.s32.totalorder %s1334_s27, 2  ;;  %p1488_p3 = por %p195_p2, %p39_p12 }
  0x3b   : > { %s1484_s17 = scalar_select %p30_p1, %s1330_s26, %s32_s15  }
  0x3c   : > { %p41_p0 = por %p40_p9, %p39_p12  ;;  %s269_s21 = sand.u32 1, %s1330_s26  }
  0x3d   : > { %s1631_s20 = scalar_select %p1488_p3, 1, 0 }
  0x3e   : > { %s941_s22 = sshll.u32 %s1334_s27, 8  ;;  %s898_s16 = sshll.u32 %s269_s21, 4 }
  0x3f   : > { %s1497_s10 = scalar_lea.hbm %s1611_s0, %s941_s22  ;;  %s273_s11 = scalar_lea.vmem [#allocation2], %s898_s16 }
  0x40   : > { %s280_s13 = sshll.u32 %s273_s11, 4  ;;  %p1499_p11 = pnand %p1070_p13, %p41_p0  ;;  %s1503_s13 = int_to_ptr.vmem [resolvable:$true] %s280_s13 }
  0x41   : > { %s1505_s15 = scalar_lea.sflag [#allocation3], %s269_s21  ;;  %s1234_s18 = scalar_lea.hbm %s1497_s10, 256 }
  0x42   : > { %p1235_p2 = scmp.ne.s32.totalorder %s1497_s10, %s1234_s18  ;;  %p1236_p5 = pneg %p1499_p11 }
  0x43   : > { %s1239_s16 = scalar_lea.hbm %s1611_s0, 512  ;;  %p1240_p1 = scmp.lt.s32.totalorder %s1497_s10, %s1611_s0 }
  0x44   : > { %p1237_p10 = pnand %p1236_p5, %p1235_p2  ;;  %p1241_p12 = scmp.lt.s32.totalorder %s1239_s16, %s1234_s18 }
  0x46   : > { %p1238_p7 = pneg %p1237_p10  ;;  %p1242_p9 = por %p1241_p12, %p1240_p1 }
  0x48   : > { %p1243_p13 = pnand %p1242_p9, %p1238_p7 }
  0x4a   : > { %1246 = shalt.err (!%p1243_p13)
}
  0x4b   : > { %s1247_s21 = scalar_lea.vmem %s1503_s13, 256  ;;  %s1341_s19 = smov [#allocation2]  }
  0x4c   : > { %p1248_p0 = scmp.ne.s32.totalorder %s1503_s13, %s1247_s21  ;;  %s1252_s1 = sshll.u32 %s1341_s19, 4  ;;  %s1253_s1 = int_to_ptr.vmem [resolvable:$false] %s1252_s1 }
  0x4d   : > { %s1254_s22 = scalar_lea.vmem %s1253_s1, 512  ;;  %p1255_p10 = scmp.lt.s32.totalorder %s1503_s13, %s1253_s1 }
  0x4e   : > { %p1250_p6 = pnand %p1248_p0, %p1236_p5  ;;  %p1256_p3 = scmp.lt.s32.totalorder %s1254_s22, %s1247_s21 }
  0x50   : > { %p1251_p2 = pneg %p1250_p6  ;;  %p1257_p4 = por %p1256_p3, %p1255_p10 }
  0x52   : > { %p1258_p8 = pnand %p1257_p4, %p1251_p2 }
  0x54   : > { %1261 = shalt.err (!%p1258_p8)
}
  0x55   : > { %s1633_s18 = smov 4   ;;  %s1634_s23 = smov 64  }
  0x56   : > { %1062 = dma.hbm_to_vmem [thread:$0]  (!%p1499_p11), %s1497_s10, 256, %s1503_s13, %s1505_s15, %s1634_s23, %s1634_s23, %s1633_s18  }
  0x57   : > { %p1635_p6 = scmp.ne.s32.totalorder %s1628_s9, 0 }
  0x58   : > { %s1532_s19 = sand.u32 (!%p1635_p6), 1, %s1326_s25   ;;  %p1636_p4 = scmp.ne.s32.totalorder (!%p1635_p6), %s1626_s30, 0 }
  0x59   : > { %292 = sbr.rel (%p1635_p6) target bundleno = 1078 (0x436), region = 48  ;;  %s902_s1 = sshll.u32 (!%p1635_p6), %s1532_s19, 4 }
  0x5a   : > { %s295_s16 = scalar_lea.sflag (!%p1635_p6), [#allocation3], %s1532_s19  ;;  %s1536_s29 = scalar_lea.vmem (!%p1635_p6), [#allocation2], %s902_s1 }
  0x5e   : > { %1305 = dma.done.wait (%p1636_p4), %s295_s16, 256  }
  0x5f   : > { %1307 = vsyncadd (%p1636_p4), %s295_s16, 4294967040  ;;  %p1637_p8 = scmp.eq.s32.totalorder %s1406_s28, 0 }
  0x61   : > { %1309 = dma.done.wait (%p1637_p8), [#allocation6], 2048   ;;  %p1638_p3 = pmov %p1637_p8 }
  0x63   : > { %1311 = vsyncadd (%p1638_p3), [#allocation6], 4294965248  ;;  %p1639_p11 = pmov %p1638_p3 }
  0x64   : > { %p1640_p5 = pmov %p1638_p3 }
  0x65   : > { %1313 = dma.done.wait (%p1639_p11), [#allocation9], 1024  }
  0x66   : > { %1315 = vsyncadd (%p1640_p5), [#allocation9], 4294966272  ;;  %v1114_v0 = vld [vmem:[#allocation5 + $0x38] sm:$0xff]   ;;  %v1115_v1 = vld [vmem:[#allocation5 + $0x30] sm:$0xff]   ;;  %s906_s11 = sshll.u32 %s1532_s19, 5  ;;  %s942_s18 = sshll.u32 %s1406_s28, 9 }
  0x67   : > { %973 = vmatprep.subr.bf16.mxu0 %v1114_v0  ;;  %v1116_v2 = vld [vmem:[#allocation5 + $0x28] sm:$0xff]   ;;  %v1117_v3 = vld [vmem:[#allocation5 + $0x20] sm:$0xff]   ;;  %v1124_v5 = vld [vmem:[#allocation7 + $0x38] sm:$0xff]   ;;  %s340_s21 = scalar_lea.vmem [#allocation10], %s906_s11  ;;  %s1568_s16 = scalar_lea.hbm %s1618_s7, %s942_s18 }
  0x68   : > { %974 = vmatpush3.bf16.msra.mxu0 %v1114_v0  ;;  %v1122_v4 = vld [vmem:[%s1536_s29] sm:$0xff]   ;;  %v1118_v7 = vld [vmem:[#allocation5 + $0x18] sm:$0xff]   ;;  %993 = vmatprep.subr.bf16.mxu1 %v1124_v5  ;;  %v1126_v9 = vld [vmem:[#allocation7 + $0x28] sm:$0xff]   ;;  %s790_s22 = sshll.u32 %s340_s21, 4  ;;  %p1641_p1 = scmp.ne.s32.totalorder %s1631_s20, 0  ;;  %s1563_s22 = int_to_ptr.vmem [resolvable:$true] %s790_s22 }
  0x69   : > { %975 = vmatprep.subr.bf16.mxu0 %v1115_v1  ;;  %989 = vmatprep.mubr.bf16.mxu0 %v1122_v4  ;;  %v1125_v6 = vld [vmem:[#allocation7 + $0x30] sm:$0xff]   ;;  %v1127_v10 = vld [vmem:[#allocation7 + $0x20] sm:$0xff]   ;;  %v1120_v11 = vld [vmem:[#allocation5 + $0x8] sm:$0xff]   ;;  %s1262_s30 = scalar_lea.vmem %s1563_s22, 512  ;;  %s1342_s28 = smov [#allocation10]  }
  0x6a   : > { %994 = vmatpush3.bf16.msra.mxu1 %v1124_v5  ;;  %v1119_v8 = vld [vmem:[#allocation5 + $0x10] sm:$0xff]   ;;  %v1128_v12 = vld [vmem:[#allocation7 + $0x18] sm:$0xff]   ;;  %v1121_v13 = vld [vmem:[#allocation5] sm:$0xff]   ;;  %p1263_p7 = scmp.ne.s32.totalorder %s1563_s22, %s1262_s30  ;;  %s1266_s9 = sshll.u32 %s1342_s28, 4  ;;  %s1267_s9 = int_to_ptr.vmem [resolvable:$false] %s1266_s9 }
  0x6b   : > { %995 = vmatprep.subr.bf16.mxu1 %v1125_v6  ;;  %v1123_v14 = vld [vmem:[%s1536_s29 + $0x8] sm:$0xff]   ;;  %v1129_v15 = vld [vmem:[#allocation7 + $0x10] sm:$0xff]   ;;  %v1131_v17 = vld [vmem:[#allocation7] sm:$0xff]   ;;  %s777_s29 = scalar_lea.sflag [#allocation4], %s1532_s19  ;;  %s1268_s10 = scalar_lea.vmem %s1267_s9, 1024 }
  0x6c   : > { %976 = vmatpush3.bf16.msra.mxu0 %v1115_v1  ;;  %v1130_v16 = vld [vmem:[#allocation7 + $0x8] sm:$0xff]   ;;  %v1132_v18 = vld [vmem:[#allocation8 + $0x38] sm:$0xff]   ;;  %v1133_v19 = vld [vmem:[#allocation8 + $0x30] sm:$0xff]   ;;  %p1264_p12 = pnand %p1263_p7, %p1641_p1  ;;  %p1269_p13 = scmp.lt.s32.totalorder %s1563_s22, %s1267_s9 }
  0x6d   : > { %977 = vmatprep.subr.bf16.mxu0 %v1116_v2  ;;  %v1134_v20 = vld [vmem:[#allocation8 + $0x28] sm:$0xff]   ;;  %v1135_v21 = vld [vmem:[#allocation8 + $0x20] sm:$0xff]   ;;  %v1136_v22 = vld [vmem:[#allocation8 + $0x18] sm:$0xff]   ;;  %p1270_p0 = scmp.lt.s32.totalorder %s1268_s10, %s1262_s30 }
  0x6e   : > { %996 = vmatpush3.bf16.msra.mxu1 %v1125_v6  ;;  %v907_v25 = vld [vmem:[%s1613_s2] ss:$0 sm:$0xff]  ;;  %v1137_v38 = vld [vmem:[#allocation8 + $0x10] sm:$0xff]   ;;  %v1138_v39 = vld [vmem:[#allocation8 + $0x8] sm:$0xff]   ;;  %p1265_p9 = pneg %p1264_p12 }
  0x6f   : > { %997 = vmatprep.subr.bf16.mxu1 %v1126_v9  ;;  %v1139_v40 = vld [vmem:[#allocation8] sm:$0xff]   ;;  %p1271_p2 = por %p1270_p0, %p1269_p13 }
  0x70   : > { %978 = vmatpush3.bf16.msra.mxu0 %v1116_v2  ;;  %v918_v43 = vld [vmem:[%s1615_s4] ss:$0 sm:$0xff] }
  0x71   : > { %979 = vmatprep.subr.bf16.mxu0 %v1117_v3  ;;  %v927_v56 = vld [vmem:[%s1617_s6] ss:$0 sm:$0xff]  ;;  %p1272_p10 = pnand %p1271_p2, %p1265_p9 }
  0x72   : > { %998 = vmatpush3.bf16.msra.mxu1 %v1126_v9 }
  0x73   : > { %999 = vmatprep.subr.bf16.mxu1 %v1127_v10 }
  0x74   : > { %980 = vmatpush3.bf16.msra.mxu0 %v1117_v3 }
  0x75   : > { %981 = vmatprep.subr.bf16.mxu0 %v1118_v7 }
  0x76   : > { %1000 = vmatpush3.bf16.msra.mxu1 %v1127_v10 }
  0x77   : > { %1001 = vmatprep.subr.bf16.mxu1 %v1128_v12 }
  0x78   : > { %982 = vmatpush3.bf16.msra.mxu0 %v1118_v7 }
  0x79   : > { %983 = vmatprep.subr.bf16.mxu0 %v1119_v8 }
  0x7a   : > { %1002 = vmatpush3.bf16.msra.mxu1 %v1128_v12 }
  0x7b   : > { %1003 = vmatprep.subr.bf16.mxu1 %v1129_v15 }
  0x7c   : > { %984 = vmatpush3.bf16.msra.mxu0 %v1119_v8 }
  0x7d   : > { %985 = vmatprep.subr.bf16.mxu0 %v1120_v11 }
  0x7e   : > { %1004 = vmatpush3.bf16.msra.mxu1 %v1129_v15 }
  0x7f   : > { %1005 = vmatprep.subr.bf16.mxu1 %v1130_v16 }
  0x80   : > { %986 = vmatpush3.bf16.msra.mxu0 %v1120_v11 }
  0x81   : > { %987 = vmatprep.subr.bf16.mxu0 %v1121_v13 }
  0x82   : > { %1006 = vmatpush3.bf16.msra.mxu1 %v1130_v16 }
  0x83   : > { %1007 = vmatprep.subr.bf16.mxu1 %v1131_v17 }
  0x84   : > { %988 = vmatpush3.bf16.msra.mxu0 %v1121_v13 }
  0x85   : > { %1013 = vmatprep.subr.bf16.mxu0 %v1132_v18 }
  0x86   : > { %1008 = vmatpush3.bf16.msra.mxu1 %v1131_v17 }
  0x87   : > { %990 = vmatmul.mubr.bf16.vlgmr.msra.gmra.mxu0 %v1123_v14 }
  0x88   : > { %1014 = vmatpush3.bf16.msra.mxu0 %v1132_v18 }
  0x89   : > { %1015 = vmatprep.subr.bf16.mxu0 %v1133_v19 }
  0x8c   : > { %1016 = vmatpush3.bf16.msra.mxu0 %v1133_v19 }
  0x8d   : > { %1017 = vmatprep.subr.bf16.mxu0 %v1134_v20 }
  0x90   : > { %1018 = vmatpush3.bf16.msra.mxu0 %v1134_v20 }
  0x91   : > { %1019 = vmatprep.subr.bf16.mxu0 %v1135_v21 }
  0x94   : > { %1020 = vmatpush3.bf16.msra.mxu0 %v1135_v21 }
  0x95   : > { %1021 = vmatprep.subr.bf16.mxu0 %v1136_v22 }
  0x98   : > { %1022 = vmatpush3.bf16.msra.mxu0 %v1136_v22 }
  0x99   : > { %1023 = vmatprep.subr.bf16.mxu0 %v1137_v38 }
  0x9c   : > { %1024 = vmatpush3.bf16.msra.mxu0 %v1137_v38 }
  0x9d   : > { %1025 = vmatprep.subr.bf16.mxu0 %v1138_v39 }
  0xa0   : > { %1026 = vmatpush3.bf16.msra.mxu0 %v1138_v39 }
  0xa1   : > { %1027 = vmatprep.subr.bf16.mxu0 %v1139_v40 }
  0xa4   : > { %1028 = vmatpush3.bf16.msra.mxu0 %v1139_v40 }
 0x147   : > { %v991_v23 = vpop.f32.mrf.mxu0 }
 0x148   : > { %v474_v29 = vadd.f32 %v991_v23, %v907_v25 }
 0x149   : > { %v465_v24 = vpop.f32.mrf.mxu0 }
 0x14a   : > { %v466_v27 = vadd.f32 %v907_v25, %v465_v24  ;;  %v482_v35 = vmax.f32 %v474_v29, 0.0 }
 0x14b   : > { %v992_v26 = vpop.f32.mrf.mxu0 }
 0x14c   : > { %v477_v28 = vadd.f32 %v992_v26, %v907_v25  ;;  %v480_v33 = vmax.f32 %v466_v27, 0.0 }
 0x14d   : > { %v468_v30 = vpop.f32.mrf.mxu0 }
 0x14e   : > { %v469_v31 = vadd.f32 %v907_v25, %v468_v30  ;;  %v483_v32 = vmax.f32 %v477_v28, 0.0 }
 0x150   : > { %v481_v34 = vmax.f32 %v469_v31, 0.0  ;;  %v485_v37 = vpack.c.bf16 %v483_v32, %v482_v35 }
 0x152   : > { %v484_v36 = vpack.c.bf16 %v481_v34, %v480_v33 }
 0x154   : > { %1009 = vmatprep.mubr.bf16.mxu1 %v484_v36 }
 0x155   : > { %1010 = vmatmul.mubr.bf16.vlgmr.msra.gmra.mxu1 %v485_v37 }
 0x215   : > { %v1011_v41 = vpop.f32.mrf.mxu1 }
 0x216   : > { %v600_v47 = vadd.f32 %v1011_v41, %v918_v43 }
 0x217   : > { %v591_v42 = vpop.f32.mrf.mxu1 }
 0x218   : > { %v592_v45 = vadd.f32 %v918_v43, %v591_v42  ;;  %v608_v53 = vmax.f32 %v600_v47, 0.0 }
 0x219   : > { %v1012_v44 = vpop.f32.mrf.mxu1 }
 0x21a   : > { %v603_v46 = vadd.f32 %v1012_v44, %v918_v43  ;;  %v606_v51 = vmax.f32 %v592_v45, 0.0 }
 0x21b   : > { %v594_v48 = vpop.f32.mrf.mxu1 }
 0x21c   : > { %v595_v49 = vadd.f32 %v918_v43, %v594_v48  ;;  %v609_v50 = vmax.f32 %v603_v46, 0.0 }
 0x21e   : > { %v607_v52 = vmax.f32 %v595_v49, 0.0  ;;  %v611_v55 = vpack.c.bf16 %v609_v50, %v608_v53 }
 0x220   : > { %v610_v54 = vpack.c.bf16 %v607_v52, %v606_v51 }
 0x222   : > { %1029 = vmatprep.mubr.bf16.mxu0 %v610_v54 }
 0x223   : > { %1030 = vmatmul.mubr.bf16.vlgmr.msra.gmra.mxu0 %v611_v55 }
 0x2e3   : > { %v1031_v57 = vpop.f32.mrf.mxu0 }
 0x2e4   : > { %v726_v58 = vadd.f32 %v1031_v57, %v927_v56 }
 0x2e5   : > { %v717_v59 = vpop.f32.mrf.mxu0 }
 0x2e6   : > { %v718_v60 = vadd.f32 %v927_v56, %v717_v59  ;;  %736 = vmax.xlane.f32.xlu1 %v726_v58 }
 0x2e7   : > { %v1032_v61 = vpop.f32.mrf.mxu0 }
 0x2e8   : > { %v729_v62 = vadd.f32 %v1032_v61, %v927_v56  ;;  %732 = vmax.xlane.f32.xlu0 %v718_v60 }
 0x2e9   : > { %v720_v63 = vpop.f32.mrf.mxu0 }
 0x2ea   : > { %v721_v0 = vadd.f32 %v927_v56, %v720_v63  ;;  %738 = vmax.xlane.f32.xlu1 %v729_v62 }
 0x2ec   : > { %734 = vmax.xlane.f32.xlu0 %v721_v0 }
 0x36f   : > { %v737_v1 = vpop.xlane.xlu1 %736 }
 0x370   : > { %v742_v2 = vsub.f32 %v726_v58, %v737_v1 }
 0x371   : > { %v733_v3 = vpop.xlane.xlu0 %732 }
 0x372   : > { %v740_v4 = vsub.f32 %v718_v60, %v733_v3  ;;  %v748_v7 = vmul.f32 1.442695, %v742_v2 }
 0x373   : > { %v739_v5 = vpop.xlane.xlu1 %738 }
 0x374   : > { %v744_v6 = vmul.f32 1.442695, %v740_v4  ;;  %v743_v9 = vsub.f32 %v729_v62, %v739_v5 }
 0x375   : > { %v735_v8 = vpop.xlane.xlu0 %734 }
 0x376   : > { %1140 = vpow2.f32 %v744_v6  ;;  %v741_v10 = vsub.f32 %v721_v0, %v735_v8  ;;  %v750_v12 = vmul.f32 1.442695, %v743_v9 }
 0x377   : > { %1142 = vpow2.f32 %v748_v7 }
 0x378   : > { %v746_v11 = vmul.f32 1.442695, %v741_v10 }
 0x37a   : > { %1144 = vpow2.f32 %v746_v11 }
 0x37b   : > { %1146 = vpow2.f32 %v750_v12 }
 0x383   : > { %v1141_v13 = vpop.eup %1140 }
 0x384   : > { %752 = vadd.xlane.f32.xlu0 %v1141_v13  ;;  %v1143_v14 = vpop.eup %1142 }
 0x387   : > { %v1145_v15 = vpop.eup %1144 }
 0x388   : > { %756 = vadd.xlane.f32.xlu0 %v1143_v14  ;;  %754 = vadd.xlane.f32.xlu1 %v1145_v15  ;;  %v1147_v16 = vpop.eup %1146 }
 0x38c   : > { %758 = vadd.xlane.f32.xlu1 %v1147_v16 }
 0x40d   : > { %v753_v17 = vpop.xlane.xlu0 %752 }
 0x40e   : > { %1148 = vlog2.f32 %v753_v17 }
 0x411   : > { %v755_v18 = vpop.xlane.xlu1 %754  ;;  %v757_v19 = vpop.xlane.xlu0 %756 }
 0x412   : > { %1150 = vlog2.f32 %v755_v18 }
 0x413   : > { %1152 = vlog2.f32 %v757_v19 }
 0x415   : > { %v759_v20 = vpop.xlane.xlu1 %758 }
 0x416   : > { %1154 = vlog2.f32 %v759_v20 }
 0x41b   : > { %v1149_v21 = vpop.eup %1148 }
 0x41c   : > { %v761_v22 = vmul.f32 0.6931472, %v1149_v21 }
 0x41e   : > { %v768_v23 = vsub.f32 %v740_v4, %v761_v22 }
 0x41f   : > { %v1151_v24 = vpop.eup %1150 }
 0x420   : > { %v1153_v25 = vpop.eup %1152  ;;  %772 = vst [vmem:[%s340_s21] sm:$0xff] %v768_v23  ;;  %v763_v26 = vmul.f32 0.6931472, %v1151_v24 }
 0x421   : > { %v765_v27 = vmul.f32 0.6931472, %v1153_v25 }
 0x422   : > { %v769_v28 = vsub.f32 %v741_v10, %v763_v26 }
 0x423   : > { %v1155_v29 = vpop.eup %1154  ;;  %v770_v30 = vsub.f32 %v742_v2, %v765_v27 }
 0x424   : > { %773 = vst [vmem:[%s340_s21 + $0x8] sm:$0xff] %v769_v28  ;;  %v767_v31 = vmul.f32 0.6931472, %v1155_v29 }
 0x425   : > { %774 = vst [vmem:[%s340_s21 + $0x10] sm:$0xff] %v770_v30 }
 0x426   : > { %v771_v32 = vsub.f32 %v743_v9, %v767_v31 }
 0x428   : > { %775 = vst [vmem:[%s340_s21 + $0x18] sm:$0xff] %v771_v32 }
 0x429   : > { %1275 = shalt.err (!%p1272_p10)
}
 0x42a   : > { %s1276_s13 = scalar_lea.hbm %s1568_s16, 512  ;;  %s1280_s11 = scalar_lea.hbm %s1618_s7, 1024 }
 0x42b   : > { %p1277_p6 = scmp.ne.s32.totalorder %s1568_s16, %s1276_s13  ;;  %p1281_p3 = scmp.lt.s32.totalorder %s1568_s16, %s1618_s7 }
 0x42c   : > { %p1282_p11 = scmp.lt.s32.totalorder %s1280_s11, %s1276_s13 }
 0x42d   : > { %p1278_p4 = pnand %p1277_p6, %p1641_p1 }
 0x42e   : > { %p1283_p5 = por %p1282_p11, %p1281_p3 }
 0x42f   : > { %p1279_p8 = pneg %p1278_p4 }
 0x431   : > { %p1284_p7 = pnand %p1283_p5, %p1279_p8 }
 0x433   : > { %1287 = shalt.err (!%p1284_p7)
}
 0x434   : > { %s1343_s23 = smov 128   ;;  %s1344_s1 = smov 8  }
 0x435   : > { %1047 = dma.vmem_to_hbm [thread:$0]  (%p1641_p1), %s1563_s22, 512, %s1568_s16, %s777_s29, %s1343_s23, %s1343_s23, %s1344_s1  }
 0x436 PF: > { %s805_s30 = sand.u32 1, %s1322_s24   ;;  %p1642_p12 = scmp.ne.s32.totalorder %s1627_s8, 0 }
 0x437   : > { %p1643_p9 = scmp.ge.s32.totalorder %s1334_s27, 2  ;;  %s806_s28 = scalar_lea.sflag [#allocation4], %s805_s30 }
 0x439   : > { %p1064_p13 = pnand %p1643_p9, %p1642_p12 }
 0x43b   : > { %p1065_p0 = pneg %p1064_p13 }
 0x43d   : > { %1317 = dma.done.wait (%p1065_p0), %s806_s28, 512  }
 0x43e   : > { %1319 = vsyncadd (%p1065_p0), %s806_s28, 4294966784  ;;  %p22_p2 = scmp.ge.s32.totalorder %s1474_s14, 4   ;;  %s1644_s24 = smov %s1326_s25 }
 0x43f   : > { %s1645_s25 = smov %s1330_s26  ;;  %s1646_s26 = smov %s1484_s17 }
 0x440   : > { %s1647_s27 = smov %s1474_s14  ;;  %24 = sbr.rel (!%p22_p2) target bundleno = 9 (0x9), region = 105 }
 0x445   :  { %811 = vsyncpa [#allocation3], 1 }
 0x446   :  { %813 = vsyncpa [#allocation3 + $0x1], 1 }
 0x447   :  { %814 = vsyncpa [#allocation6], 1 }
 0x448   :  { %815 = vsyncpa [#allocation9], 1 }
 0x449   :  { %816 = vsyncpa [#allocation4], 1 }
 0x44a   :  { %818 = vsyncpa [#allocation4 + $0x1], 1 }

</bundles_post_ra>
